<compile_context>
chip_gen: v5e
topology: v5e:2x2
jax: 0.10.0
libtpu: 0.0.40
codegen_flags: <defaults>
</compile_context>

<pallas_src>
import jax
import jax.numpy as jnp
from jax.experimental import pallas as pl
from jax.experimental.pallas import tpu as pltpu


# ---------------------------------------------------------------------------
# Fused kernel: one grid step = one batch element.
# ---------------------------------------------------------------------------
def _temporal_net_kernel(x_ref, wl_ref, bc_ref, w1_ref, b1_ref, w2t_ref, b2_ref,
                         out_ref):
    # x_ref:   [1, C, T, H, W]  one batch element, NCTHW layout
    # wl_ref:  [C*3, W, 3]      conv weights folded with the GAP column window;
    #                           rows ordered (c, dy), lanes = column index k
    # bc_ref:  [1, 3]           conv bias
    # w1_ref:  [3, F]           resnet101 surrogate projection (F = 1000)
    # b1_ref:  [1, F]
    # w2t_ref: [n_classes, F]   fc weight, transposed (F on lanes -> lane-dense)
    # b2_ref:  [1, n_classes]
    # out_ref: [1, 1, n_classes]
    _, C, T, H, W = x_ref.shape
    Ho, Wo = H - 2, W - 2
    inv = 1.0 / float(T * Ho * Wo)

    acc = jnp.zeros((1, 3), jnp.float32)
    for c in range(C):
        # Sum over the T segments first (exact: everything up to the segment
        # mean is linear and the conv weights are shared across segments).
        xc = jnp.sum(x_ref[0, c], axis=0)                       # [H, W]
        # Row-window sums via one aligned column reduction + border rows
        # (replaces 9 full [Ho,Wo] 2-D reductions per channel).
        colsum = jnp.sum(xc, axis=0, keepdims=True)             # [1, W]
        r0, r1 = xc[0:1, :], xc[1:2, :]
        rm2, rm1 = xc[H - 2:H - 1, :], xc[H - 1:H, :]
        rows = (colsum - rm2 - rm1,     # dy = 0: rows 0 .. H-3
                colsum - r0 - rm1,      # dy = 1: rows 1 .. H-2
                colsum - r0 - r1)       # dy = 2: rows 2 .. H-1
        for dy in range(3):
            # wl already contains (conv tap dx) x (valid GAP column window),
            # so one tiny dot applies all 3 taps of this (c, dy) row.
            acc = acc + jnp.dot(rows[dy], wl_ref[c * 3 + dy],
                                preferred_element_type=jnp.float32)   # [1, 3]

    # Mean-over-segments GAP features of the conv output (exact fusion).
    gbar = acc * inv + bc_ref[...]                              # [1, 3]

    # resnet101 surrogate + fc, applied once to the segment-mean features.
    h = jnp.dot(gbar, w1_ref[...], preferred_element_type=jnp.float32) + b1_ref[...]
    y = jax.lax.dot_general(h, w2t_ref[...],
                            dimension_numbers=(((1,), (1,)), ((), ())),
                            preferred_element_type=jnp.float32) + b2_ref[...]
    out_ref[...] = y.reshape(1, 1, -1)


# ---------------------------------------------------------------------------
# Host-side weight folding: conv taps (dx) x GAP column window -> per-lane
# weights.  wl[c*3+dy, k, o] = sum_{dx : dx <= k <= dx + Wo - 1} w[o, c, dy, dx]
# ---------------------------------------------------------------------------
def _lane_window_weights(w_conv, W):
    O, C, _, KW = w_conv.shape
    Wo = W - 2
    k = jnp.arange(W)[None, :]
    dx = jnp.arange(KW)[:, None]
    cover = ((k >= dx) & (k <= dx + Wo - 1)).astype(jnp.float32)    # [3, W]
    wl = jnp.einsum('ocyx,xk->cyko', w_conv.astype(jnp.float32), cover)  # [C,3,W,3]
    return wl.reshape(C * 3, W, O)


# ---------------------------------------------------------------------------
# TemporalNet forward
# ---------------------------------------------------------------------------
def temporal_net_forward(frames, params, n_classes):
    B, C, T, H, W = frames.shape
    wl = _lane_window_weights(params["w_conv"], W)           # [C*3, W, 3]
    bc = params["b_conv"].reshape(1, 3)
    w1, b1 = params["w1"], params["b1"]
    w2t = params["w2"].T                                     # [n_classes, 1000] lane-dense
    b2 = params["b2"]
    F = w1.shape[1]

    out = pl.pallas_call(
        _temporal_net_kernel,
        out_shape=jax.ShapeDtypeStruct((B, 1, n_classes), jnp.float32),
        grid=(B,),
        in_specs=[
            pl.BlockSpec((1, C, T, H, W), lambda b: (b, 0, 0, 0, 0)),
            pl.BlockSpec((C * 3, W, 3), lambda b: (0, 0, 0)),
            pl.BlockSpec((1, 3), lambda b: (0, 0)),
            pl.BlockSpec((3, F), lambda b: (0, 0)),
            pl.BlockSpec((1, F), lambda b: (0, 0)),
            pl.BlockSpec((n_classes, F), lambda b: (0, 0)),
            pl.BlockSpec((1, n_classes), lambda b: (0, 0)),
        ],
        out_specs=pl.BlockSpec((1, 1, n_classes), lambda b: (b, 0, 0)),
        compiler_params=pltpu.CompilerParams(
            dimension_semantics=("parallel",)),
    )(frames, wl, bc, w1, b1, w2t, b2)
    return out.reshape(B, n_classes)


def init_params(key, n_classes=6, n_consecutive=1):
    c_in = 2 * n_consecutive
    ks = jax.random.split(key, 6)
    return {
        # nn.Conv2d(2*n_consecutive, 3, kernel_size=3): weight [3, c_in, 3, 3], bias [3]
        "w_conv": 0.1 * jax.random.normal(ks[0], (3, c_in, 3, 3), jnp.float32),
        "b_conv": 0.1 * jax.random.normal(ks[1], (3,), jnp.float32),
        # resnet101 surrogate projection to 1000-dim features  # TODO(synk)
        "w1": 0.1 * jax.random.normal(ks[2], (3, 1000), jnp.float32),
        "b1": 0.1 * jax.random.normal(ks[3], (1, 1000), jnp.float32),
        # nn.Linear(1000, n_classes)
        "w2": 0.05 * jax.random.normal(ks[4], (1000, n_classes), jnp.float32),
        "b2": 0.05 * jax.random.normal(ks[5], (1, n_classes), jnp.float32),
    }


def _reference_forward(frames, params, n_classes):
    """Pure-JAX reference: per-segment conv -> GAP -> dense -> fc, mean over segments."""
    B, C, T, H, W = frames.shape
    Ho, Wo = H - 2, W - 2
    w, b = params["w_conv"], params["b_conv"]
    hi = jax.lax.Precision.HIGHEST
    outs = []
    for t in range(T):
        x = frames[:, :, t]                               # [B, C, H, W]
        chans = []
        for o in range(3):
            acc = jnp.zeros((B, Ho, Wo), jnp.float32)
            for c in range(C):
                for dy in range(3):
                    for dx in range(3):
                        acc = acc + w[o, c, dy, dx] * x[:, c, dy:dy + Ho, dx:dx + Wo]
            chans.append(acc + b[o])
        conv = jnp.stack(chans, axis=1)                   # [B, 3, Ho, Wo]
        gap = conv.mean(axis=(2, 3))                      # [B, 3]
        h = jnp.dot(gap, params["w1"], precision=hi) + params["b1"]
        y = jnp.dot(h, params["w2"], precision=hi) + params["b2"]
        outs.append(y)
    return jnp.mean(jnp.stack(outs, axis=1), axis=1)


if __name__ == "__main__":
    n_classes = 6
    n_segments = 3
    n_consecutive = 1
    B, H, W = 2, 16, 16

    key = jax.random.PRNGKey(0)
    k_params, k_frames = jax.random.split(key)
    params = init_params(k_params, n_classes=n_classes, n_consecutive=n_consecutive)

    # frames: [B, 2*n_consecutive, n_segments, H, W] (PyTorch NCTHW convention)
    frames = jax.random.normal(
        k_frames, (B, 2 * n_consecutive, n_segments, H, W), jnp.float32
    )

    out = temporal_net_forward(frames, params, n_classes)
    out = jax.block_until_ready(out)
    assert out.shape == (B, n_classes), out.shape

    ref = _reference_forward(frames, params, n_classes)
    assert jnp.allclose(out, ref, atol=5e-3, rtol=5e-3), (out, ref)
    print("KERNEL_OK")
</pallas_src>

<mosaic_0001>
module attributes {stable_mosaic.version = 11 : i64} {
  func.func @_temporal_net_kernel(%arg0: i32, %arg1: memref<1x2x3x16x16xf32, #tpu.memory_space<vmem>>, %arg2: memref<6x16x3xf32, #tpu.memory_space<vmem>>, %arg3: memref<1x3xf32, #tpu.memory_space<vmem>>, %arg4: memref<3x1000xf32, #tpu.memory_space<vmem>>, %arg5: memref<1x1000xf32, #tpu.memory_space<vmem>>, %arg6: memref<6x1000xf32, #tpu.memory_space<vmem>>, %arg7: memref<1x6xf32, #tpu.memory_space<vmem>>, %arg8: memref<1x1x6xf32, #tpu.memory_space<vmem>>) attributes {dimension_semantics = [#tpu.dimension_semantics<parallel>], iteration_bounds = array<i64: 2>, scalar_prefetch = 0 : i64, scratch_operands = 0 : i64, tpu.core_type = #tpu.core_type<tc>, window_params = [{transform_indices = @transform_0, window_bounds = array<i64: 1, 2, 3, 16, 16>}, {pipeline_mode = #tpu.pipeline_mode<synchronous>, transform_indices = @transform_1, window_bounds = array<i64: 6, 16, 3>}, {pipeline_mode = #tpu.pipeline_mode<synchronous>, transform_indices = @transform_2, window_bounds = array<i64: 1, 3>}, {pipeline_mode = #tpu.pipeline_mode<synchronous>, transform_indices = @transform_3, window_bounds = array<i64: 3, 1000>}, {pipeline_mode = #tpu.pipeline_mode<synchronous>, transform_indices = @transform_4, window_bounds = array<i64: 1, 1000>}, {pipeline_mode = #tpu.pipeline_mode<synchronous>, transform_indices = @transform_5, window_bounds = array<i64: 6, 1000>}, {pipeline_mode = #tpu.pipeline_mode<synchronous>, transform_indices = @transform_6, window_bounds = array<i64: 1, 6>}, {transform_indices = @transform_7, window_bounds = array<i64: 1, 1, 6>}]} {
    %cst = arith.constant 0.000000e+00 : f32
    %0 = vector.broadcast %cst : f32 to vector<1x3xf32>
    %c0 = arith.constant 0 : index
    %c0_0 = arith.constant 0 : index
    %c0_1 = arith.constant 0 : index
    %c0_2 = arith.constant 0 : index
    %c0_3 = arith.constant 0 : index
    %1 = vector.load %arg1[%c0, %c0_0, %c0_1, %c0_2, %c0_3] : memref<1x2x3x16x16xf32, #tpu.memory_space<vmem>>, vector<1x1x3x16x16xf32>
    %2 = vector.shape_cast %1 : vector<1x1x3x16x16xf32> to vector<3x16x16xf32>
    %cst_4 = arith.constant dense<0.000000e+00> : vector<16x16xf32>
    %3 = vector.multi_reduction <add>, %2, %cst_4 [0] : vector<3x16x16xf32> to vector<16x16xf32>
    %cst_5 = arith.constant dense<0.000000e+00> : vector<16xf32>
    %4 = vector.multi_reduction <add>, %3, %cst_5 [0] : vector<16x16xf32> to vector<16xf32>
    %5 = vector.shape_cast %4 : vector<16xf32> to vector<1x16xf32>
    %6 = vector.extract_strided_slice %3 {offsets = [0, 0], sizes = [1, 16], strides = [1, 1]} : vector<16x16xf32> to vector<1x16xf32>
    %7 = vector.extract_strided_slice %3 {offsets = [1, 0], sizes = [1, 16], strides = [1, 1]} : vector<16x16xf32> to vector<1x16xf32>
    %8 = vector.extract_strided_slice %3 {offsets = [14, 0], sizes = [1, 16], strides = [1, 1]} : vector<16x16xf32> to vector<1x16xf32>
    %9 = vector.extract_strided_slice %3 {offsets = [15, 0], sizes = [1, 16], strides = [1, 1]} : vector<16x16xf32> to vector<1x16xf32>
    %10 = arith.subf %5, %8 : vector<1x16xf32>
    %11 = arith.subf %10, %9 : vector<1x16xf32>
    %12 = arith.subf %5, %6 : vector<1x16xf32>
    %13 = arith.subf %12, %9 : vector<1x16xf32>
    %14 = arith.subf %5, %6 : vector<1x16xf32>
    %15 = arith.subf %14, %7 : vector<1x16xf32>
    %c0_6 = arith.constant 0 : index
    %c0_7 = arith.constant 0 : index
    %c0_8 = arith.constant 0 : index
    %16 = vector.load %arg2[%c0_6, %c0_7, %c0_8] : memref<6x16x3xf32, #tpu.memory_space<vmem>>, vector<1x16x3xf32>
    %17 = vector.shape_cast %16 : vector<1x16x3xf32> to vector<16x3xf32>
    %cst_9 = arith.constant dense<0.000000e+00> : vector<1x3xf32>
    %18 = tpu.matmul %11, %17, %cst_9 {dimension_numbers = #tpu.dot_dimension_numbers<[1], [0], [0], [1], [0, 0, 1, 1], [], []>} : vector<1x16xf32>, vector<16x3xf32>, vector<1x3xf32> -> vector<1x3xf32>
    %19 = arith.addf %0, %18 : vector<1x3xf32>
    %c1 = arith.constant 1 : index
    %c0_10 = arith.constant 0 : index
    %c0_11 = arith.constant 0 : index
    %20 = vector.load %arg2[%c1, %c0_10, %c0_11] : memref<6x16x3xf32, #tpu.memory_space<vmem>>, vector<1x16x3xf32>
    %21 = vector.shape_cast %20 : vector<1x16x3xf32> to vector<16x3xf32>
    %cst_12 = arith.constant dense<0.000000e+00> : vector<1x3xf32>
    %22 = tpu.matmul %13, %21, %cst_12 {dimension_numbers = #tpu.dot_dimension_numbers<[1], [0], [0], [1], [0, 0, 1, 1], [], []>} : vector<1x16xf32>, vector<16x3xf32>, vector<1x3xf32> -> vector<1x3xf32>
    %23 = arith.addf %19, %22 : vector<1x3xf32>
    %c2 = arith.constant 2 : index
    %c0_13 = arith.constant 0 : index
    %c0_14 = arith.constant 0 : index
    %24 = vector.load %arg2[%c2, %c0_13, %c0_14] : memref<6x16x3xf32, #tpu.memory_space<vmem>>, vector<1x16x3xf32>
    %25 = vector.shape_cast %24 : vector<1x16x3xf32> to vector<16x3xf32>
    %cst_15 = arith.constant dense<0.000000e+00> : vector<1x3xf32>
    %26 = tpu.matmul %15, %25, %cst_15 {dimension_numbers = #tpu.dot_dimension_numbers<[1], [0], [0], [1], [0, 0, 1, 1], [], []>} : vector<1x16xf32>, vector<16x3xf32>, vector<1x3xf32> -> vector<1x3xf32>
    %27 = arith.addf %23, %26 : vector<1x3xf32>
    %c0_16 = arith.constant 0 : index
    %c1_17 = arith.constant 1 : index
    %c0_18 = arith.constant 0 : index
    %c0_19 = arith.constant 0 : index
    %c0_20 = arith.constant 0 : index
    %28 = vector.load %arg1[%c0_16, %c1_17, %c0_18, %c0_19, %c0_20] : memref<1x2x3x16x16xf32, #tpu.memory_space<vmem>>, vector<1x1x3x16x16xf32>
    %29 = vector.shape_cast %28 : vector<1x1x3x16x16xf32> to vector<3x16x16xf32>
    %cst_21 = arith.constant dense<0.000000e+00> : vector<16x16xf32>
    %30 = vector.multi_reduction <add>, %29, %cst_21 [0] : vector<3x16x16xf32> to vector<16x16xf32>
    %cst_22 = arith.constant dense<0.000000e+00> : vector<16xf32>
    %31 = vector.multi_reduction <add>, %30, %cst_22 [0] : vector<16x16xf32> to vector<16xf32>
    %32 = vector.shape_cast %31 : vector<16xf32> to vector<1x16xf32>
    %33 = vector.extract_strided_slice %30 {offsets = [0, 0], sizes = [1, 16], strides = [1, 1]} : vector<16x16xf32> to vector<1x16xf32>
    %34 = vector.extract_strided_slice %30 {offsets = [1, 0], sizes = [1, 16], strides = [1, 1]} : vector<16x16xf32> to vector<1x16xf32>
    %35 = vector.extract_strided_slice %30 {offsets = [14, 0], sizes = [1, 16], strides = [1, 1]} : vector<16x16xf32> to vector<1x16xf32>
    %36 = vector.extract_strided_slice %30 {offsets = [15, 0], sizes = [1, 16], strides = [1, 1]} : vector<16x16xf32> to vector<1x16xf32>
    %37 = arith.subf %32, %35 : vector<1x16xf32>
    %38 = arith.subf %37, %36 : vector<1x16xf32>
    %39 = arith.subf %32, %33 : vector<1x16xf32>
    %40 = arith.subf %39, %36 : vector<1x16xf32>
    %41 = arith.subf %32, %33 : vector<1x16xf32>
    %42 = arith.subf %41, %34 : vector<1x16xf32>
    %c3 = arith.constant 3 : index
    %c0_23 = arith.constant 0 : index
    %c0_24 = arith.constant 0 : index
    %43 = vector.load %arg2[%c3, %c0_23, %c0_24] : memref<6x16x3xf32, #tpu.memory_space<vmem>>, vector<1x16x3xf32>
    %44 = vector.shape_cast %43 : vector<1x16x3xf32> to vector<16x3xf32>
    %cst_25 = arith.constant dense<0.000000e+00> : vector<1x3xf32>
    %45 = tpu.matmul %38, %44, %cst_25 {dimension_numbers = #tpu.dot_dimension_numbers<[1], [0], [0], [1], [0, 0, 1, 1], [], []>} : vector<1x16xf32>, vector<16x3xf32>, vector<1x3xf32> -> vector<1x3xf32>
    %46 = arith.addf %27, %45 : vector<1x3xf32>
    %c4 = arith.constant 4 : index
    %c0_26 = arith.constant 0 : index
    %c0_27 = arith.constant 0 : index
    %47 = vector.load %arg2[%c4, %c0_26, %c0_27] : memref<6x16x3xf32, #tpu.memory_space<vmem>>, vector<1x16x3xf32>
    %48 = vector.shape_cast %47 : vector<1x16x3xf32> to vector<16x3xf32>
    %cst_28 = arith.constant dense<0.000000e+00> : vector<1x3xf32>
    %49 = tpu.matmul %40, %48, %cst_28 {dimension_numbers = #tpu.dot_dimension_numbers<[1], [0], [0], [1], [0, 0, 1, 1], [], []>} : vector<1x16xf32>, vector<16x3xf32>, vector<1x3xf32> -> vector<1x3xf32>
    %50 = arith.addf %46, %49 : vector<1x3xf32>
    %c5 = arith.constant 5 : index
    %c0_29 = arith.constant 0 : index
    %c0_30 = arith.constant 0 : index
    %51 = vector.load %arg2[%c5, %c0_29, %c0_30] : memref<6x16x3xf32, #tpu.memory_space<vmem>>, vector<1x16x3xf32>
    %52 = vector.shape_cast %51 : vector<1x16x3xf32> to vector<16x3xf32>
    %cst_31 = arith.constant dense<0.000000e+00> : vector<1x3xf32>
    %53 = tpu.matmul %42, %52, %cst_31 {dimension_numbers = #tpu.dot_dimension_numbers<[1], [0], [0], [1], [0, 0, 1, 1], [], []>} : vector<1x16xf32>, vector<16x3xf32>, vector<1x3xf32> -> vector<1x3xf32>
    %54 = arith.addf %50, %53 : vector<1x3xf32>
    %cst_32 = arith.constant 0.00170068024 : f32
    %55 = vector.broadcast %cst_32 : f32 to vector<1x3xf32>
    %56 = arith.mulf %54, %55 : vector<1x3xf32>
    %c0_33 = arith.constant 0 : index
    %c0_34 = arith.constant 0 : index
    %57 = vector.load %arg3[%c0_33, %c0_34] : memref<1x3xf32, #tpu.memory_space<vmem>>, vector<1x3xf32>
    %58 = arith.addf %56, %57 : vector<1x3xf32>
    %c0_35 = arith.constant 0 : index
    %c0_36 = arith.constant 0 : index
    %59 = vector.load %arg4[%c0_35, %c0_36] : memref<3x1000xf32, #tpu.memory_space<vmem>>, vector<3x1000xf32>
    %cst_37 = arith.constant dense<0.000000e+00> : vector<1x1000xf32>
    %60 = tpu.matmul %58, %59, %cst_37 {dimension_numbers = #tpu.dot_dimension_numbers<[1], [0], [0], [1], [0, 0, 1, 1], [], []>} : vector<1x3xf32>, vector<3x1000xf32>, vector<1x1000xf32> -> vector<1x1000xf32>
    %c0_38 = arith.constant 0 : index
    %c0_39 = arith.constant 0 : index
    %61 = vector.load %arg5[%c0_38, %c0_39] : memref<1x1000xf32, #tpu.memory_space<vmem>>, vector<1x1000xf32>
    %62 = arith.addf %60, %61 : vector<1x1000xf32>
    %c0_40 = arith.constant 0 : index
    %c0_41 = arith.constant 0 : index
    %63 = vector.load %arg6[%c0_40, %c0_41] : memref<6x1000xf32, #tpu.memory_space<vmem>>, vector<6x1000xf32>
    %cst_42 = arith.constant dense<0.000000e+00> : vector<1x6xf32>
    %64 = tpu.matmul %62, %63, %cst_42 {dimension_numbers = #tpu.dot_dimension_numbers<[1], [1], [0], [0], [0, 0, 1, 0], [], []>} : vector<1x1000xf32>, vector<6x1000xf32>, vector<1x6xf32> -> vector<1x6xf32>
    %c0_43 = arith.constant 0 : index
    %c0_44 = arith.constant 0 : index
    %65 = vector.load %arg7[%c0_43, %c0_44] : memref<1x6xf32, #tpu.memory_space<vmem>>, vector<1x6xf32>
    %66 = arith.addf %64, %65 : vector<1x6xf32>
    %67 = vector.shape_cast %66 : vector<1x6xf32> to vector<1x1x6xf32>
    %c0_45 = arith.constant 0 : index
    %c0_46 = arith.constant 0 : index
    %c0_47 = arith.constant 0 : index
    %68 = vector.load %arg8[%c0_45, %c0_46, %c0_47] : memref<1x1x6xf32, #tpu.memory_space<vmem>>, vector<1x1x6xf32>
    tpu.vector_store %arg8[%c0_45, %c0_46, %c0_47], %67 {strides = array<i32>} : memref<1x1x6xf32, #tpu.memory_space<vmem>>, vector<1x1x6xf32>,
    return
  }
  func.func @transform_0(%arg0: i32) -> (i32, i32, i32, i32, i32) {
    %c0_i32 = arith.constant 0 : i32
    %c0_i32_0 = arith.constant 0 : i32
    %c0_i32_1 = arith.constant 0 : i32
    %c0_i32_2 = arith.constant 0 : i32
    %c0_i32_3 = arith.constant 0 : i32
    return %arg0, %c0_i32, %c0_i32_0, %c0_i32_1, %c0_i32_2 : i32, i32, i32, i32, i32
  }
  func.func @transform_1(%arg0: i32) -> (i32, i32, i32) {
    %c0_i32 = arith.constant 0 : i32
    %c0_i32_0 = arith.constant 0 : i32
    %c0_i32_1 = arith.constant 0 : i32
    %c0_i32_2 = arith.constant 0 : i32
    return %c0_i32, %c0_i32_0, %c0_i32_1 : i32, i32, i32
  }
  func.func @transform_2(%arg0: i32) -> (i32, i32) {
    %c0_i32 = arith.constant 0 : i32
    %c0_i32_0 = arith.constant 0 : i32
    %c0_i32_1 = arith.constant 0 : i32
    return %c0_i32, %c0_i32_0 : i32, i32
  }
  func.func @transform_3(%arg0: i32) -> (i32, i32) {
    %c0_i32 = arith.constant 0 : i32
    %c0_i32_0 = arith.constant 0 : i32
    %c0_i32_1 = arith.constant 0 : i32
    return %c0_i32, %c0_i32_0 : i32, i32
  }
  func.func @transform_4(%arg0: i32) -> (i32, i32) {
    %c0_i32 = arith.constant 0 : i32
    %c0_i32_0 = arith.constant 0 : i32
    %c0_i32_1 = arith.constant 0 : i32
    return %c0_i32, %c0_i32_0 : i32, i32
  }
  func.func @transform_5(%arg0: i32) -> (i32, i32) {
    %c0_i32 = arith.constant 0 : i32
    %c0_i32_0 = arith.constant 0 : i32
    %c0_i32_1 = arith.constant 0 : i32
    return %c0_i32, %c0_i32_0 : i32, i32
  }
  func.func @transform_6(%arg0: i32) -> (i32, i32) {
    %c0_i32 = arith.constant 0 : i32
    %c0_i32_0 = arith.constant 0 : i32
    %c0_i32_1 = arith.constant 0 : i32
    return %c0_i32, %c0_i32_0 : i32, i32
  }
  func.func @transform_7(%arg0: i32) -> (i32, i32, i32) {
    %c0_i32 = arith.constant 0 : i32
    %c0_i32_0 = arith.constant 0 : i32
    %c0_i32_1 = arith.constant 0 : i32
    return %arg0, %c0_i32, %c0_i32_0 : i32, i32, i32
  }
}

</mosaic_0001>

<bundles_post_ra>
// kernel: tpu_custom_call.1
= control target key start
LH: loop header
LB: loop body
LE: loop exit
PB: predicated region body
PF: predicated region fallthrough
CT: control target
= control target key end

     0   :  { %12 = vsyncpa [#allocation3], 0  ;;  %s1502_s0 = inlined_call_operand.hbm [shape: f32[2,2,3,16,16], index: 0, kind: input, shape index: {}]   ;;  %s1503_s1 = inlined_call_operand.vmem [shape: f32[6,16,3], index: 1, kind: input, shape index: {}]   ;;  %s1504_s2 = inlined_call_operand.vmem [shape: f32[1,3], index: 2, kind: input, shape index: {}]   ;;  %s1505_s3 = inlined_call_operand.vmem [shape: f32[3,1000], index: 3, kind: input, shape index: {}]   ;;  %s1506_s4 = inlined_call_operand.vmem [shape: f32[1,1000], index: 4, kind: input, shape index: {}]   ;;  %s1507_s5 = inlined_call_operand.vmem [shape: f32[6,1000], index: 5, kind: input, shape index: {}]   ;;  %s1508_s6 = inlined_call_operand.vmem [shape: f32[1,6], index: 6, kind: input, shape index: {}]   ;;  %s1509_s7 = inlined_call_operand.hbm [shape: f32[2,1,6], index: 7, kind: output, shape index: {}]  }
   0x1   :  { %14 = vsyncpa [#allocation3 + $0x1], 0 }
   0x2   :  { %15 = vsyncpa [#allocation4], 0 }
   0x3   :  { %17 = vsyncpa [#allocation4 + $0x1], 0  ;;  %s1257_s24 = smov 0   ;;  %s1259_s25 = smov 0  }
   0x4   :  { %s1261_s26 = smov 0   ;;  %s1263_s27 = smov 0  }
   0x5 LB: > { %1511 = sst [smem:[#allocation8_spill]] %s1209_s26  ;;  %s1278_s28 = sadd.s32 4294967295, %s1213_s27   ;;  %s1213_s27 = sphi %s1263_s27, %s1521_s27   ;;  %s1209_s26 = sphi %s1261_s26, %s1518_s26   ;;  %s1205_s25 = sphi %s1259_s25, %s1520_s25   ;;  %s1201_s24 = sphi %s1257_s24, %s1519_s24  }
   0x6   : > { %s1019_s29 = sadd.s32 4294967294, %s1213_s27   ;;  %s1282_s30 = sadd.s32 1, %s1213_s27  }
   0x7   : > { %s30_s8 = sadd.s32 1, %s1209_s26  ;;  %s27_s9 = ssub.s32 %s1213_s27, %s1282_s30 }
   0x8   : > { %p37_p0 = scmp.ne.s32.totalorder %s1209_s26, %s1205_s25  ;;  %p28_p1 = scmp.eq.s32.totalorder %s27_s9, 0 }
   0x9   : > { %p38_p2 = scmp.eq.s32.totalorder %s1213_s27, 0  ;;  %p43_p3 = scmp.ne.s32.totalorder %s1205_s25, %s1201_s24 }
   0xa   : > { %p44_p4 = scmp.eq.s32.totalorder %s1278_s28, 0  ;;  %p193_p7 = scmp.eq.s32.totalorder %s1278_s28, 1 }
   0xb   : > { %s1294_s10 = scalar_select %p28_p1, %s1209_s26, %s30_s8  }
   0xc   : > { %p39_p5 = por %p38_p2, %p37_p0  ;;  %p1296_p6 = por %p44_p4, %p43_p3 }
   0xd   : > { %1512 = sst [smem:[#allocation9_spill]] %s1294_s10  ;;  %p199_p8 = scmp.eq.s32.totalorder %s1019_s29, 1 }
   0xe   : > { %p1021_p9 = scmp.ge.s32.totalorder %s1213_s27, 2  ;;  %p1081_p10 = scmp.lt.s32.totalorder %s1213_s27, 2 }
   0xf   : > { %p1303_p11 = por %p193_p7, %p37_p0  ;;  %p1307_p12 = por %p199_p8, %p43_p3 }
  0x10   : > { %s237_s14 = sand.u32 1, %s1209_s26   ;;  %s1067_s15 = smul.u32 96, %s1213_s27 }
  0x11   : > { %s1066_s16 = smul.u32 96, %s237_s14  ;;  %p1316_p13 = pnand %p1081_p10, %p39_p5 }
  0x12   : > { %s246_s19 = scalar_lea.hbm %s1502_s0, %s1067_s15  ;;  %s238_s29 = scalar_lea.sflag [#allocation3], %s237_s14 }
  0x13   : > { %s247_s21 = sshll.u32 %s246_s19, 4  ;;  %s241_s22 = scalar_lea.vmem [#allocation2], %s1066_s16  ;;  %s248_s21 = int_to_ptr.hbm [resolvable:$true] %s247_s21 }
  0x14   : > { %s249_s23 = sshll.u32 %s241_s22, 4  ;;  %s1117_s8 = sshra.s32 %s248_s21, 4  ;;  %s250_s23 = int_to_ptr.vmem [resolvable:$true] %s249_s23  ;;  %s1118_s8 = int_to_ptr.hbm [resolvable:$true] %s1117_s8 }
  0x15   : > { %s1119_s9 = scalar_lea.hbm %s1118_s8, 96  ;;  %p1121_p1 = pneg %p1316_p13 }
  0x16   : > { %p1120_p0 = scmp.ne.s32.totalorder %s1118_s8, %s1119_s9  ;;  %s1124_s18 = scalar_lea.hbm %s1502_s0, 192 }
  0x17   : > { %p1125_p4 = scmp.lt.s32.totalorder %s1118_s8, %s1502_s0  ;;  %p1126_p5 = scmp.lt.s32.totalorder %s1124_s18, %s1119_s9 }
  0x18   : > { %p1122_p2 = pnand %p1121_p1, %p1120_p0 }
  0x19   : > { %p1127_p7 = por %p1126_p5, %p1125_p4 }
  0x1a   : > { %p1123_p3 = pneg %p1122_p2 }
  0x1c   : > { %p1128_p8 = pnand %p1127_p7, %p1123_p3 }
  0x1e   : > { %1131 = shalt.err (!%p1128_p8)
}
  0x1f   : > { %s1215_s14 = smov 128   ;;  %s1216_s16 = smov 8  }
  0x20   : > { %1076 = dma.hbm_to_vmem [thread:$0]  (!%p1316_p13), %s248_s21, 1536, %s250_s23, %s238_s29, %s1215_s14, %s1215_s14, %s1216_s16  }
  0x21   : > { %p1023_p10 = scmp.ge.s32.totalorder %s1213_s27, 1  ;;  %p257_p0 = scmp.lt.s32.totalorder %s1213_s27, 3 }
  0x23   : > { %p258_p1 = pnand %p1023_p10, %p257_p0 }
  0x24   : > { %s1333_s19 = sand.u32 (!%p258_p1), 1, %s1205_s25  }
  0x25   : > { %261 = sbr.rel (%p258_p1) target bundleno = 503 (0x1f7), region = 48  ;;  %s264_s10 = scalar_lea.sflag (!%p258_p1), [#allocation3], %s1333_s19 }
  0x26   : > { %s1068_s26 = smul.u32 (!%p258_p1), 96, %s1333_s19 }
  0x28   : > { %s1337_s22 = scalar_lea.vmem (!%p258_p1), [#allocation2], %s1068_s26 }
  0x2a   : > { %1192 = dma.done.wait (%p1296_p6), %s264_s10, 1536  }
  0x2b   : > { %1194 = vsyncadd (%p1296_p6), %s264_s10, 4294965760  ;;  %vm304_vm0 = vcmask 130048   ;;  %v1029_v0 = vld [vmem:[%s1503_s1 + $0x28] sm:$0xff]  ;;  %v1025_v1 = vld [vmem:[%s1503_s1 + $0x18] sm:$0xff]  ;;  %vm585_vm1 = vcmask 1042432   ;;  %vm581_vm2 = vcmask 23552   ;;  %s949_s16 = scalar_lea.hbm %s1509_s7, %s1278_s28 }
  0x2c   : > { %v338_v2 = vld [vmem:[%s1503_s1 + $0x8] sm:$0xff]  ;;  %409 = vmatpush.msra.mxu2 %v1029_v0  ;;  %359 = vmatpush.msra.mxu0 %v1025_v1  ;;  %v1028_v3 = vld [vmem:[%s1503_s1 + $0x20] sm:$0xff]  ;;  %v1038_v4 = vld [vmem:[%s1503_s1 + $0x38] sm:$0xff]  ;;  %vm771_vm3 = vcmask 850944   ;;  %s297_s26 = scalar_lea.vmem [#allocation5], %s1333_s19  ;;  %s953_s20 = sshll.u32 %s949_s16, 4  ;;  %s954_s20 = int_to_ptr.hbm [resolvable:$true] %s953_s20 }
  0x2d   : > { %v298_v5 = vld [vmem:[%s1337_s22] sm:$0xff]  ;;  %383 = vmatpush.msra.mxu1 %v338_v2  ;;  %476 = vmatpush.msra.mxu3 %v1038_v4  ;;  %v299_v6 = vld [vmem:[%s1337_s22 + $0x8] sm:$0xff]  ;;  %v300_v7 = vld [vmem:[%s1337_s22 + $0x10] sm:$0xff]  ;;  %s951_s10 = sshll.u32 %s297_s26, 4  ;;  %vm938_vm4 = vcmask 40960   ;;  %s941_s21 = scalar_lea.sflag [#allocation4], %s1333_s19  ;;  %s952_s10 = int_to_ptr.vmem [resolvable:$true] %s951_s10 }
  0x2e   : > { %v301_v8 = vld [vmem:[%s1337_s22 + $0x18] sm:$0xff]  ;;  %v305_v9 = vsel %vm304_vm0, %v298_v5, 0.0  ;;  %410 = vmatpush.msra.mxu2 %v1028_v3  ;;  %v302_v10 = vld [vmem:[%s1337_s22 + $0x20] sm:$0xff]  ;;  %v303_v11 = vld [vmem:[%s1337_s22 + $0x28] sm:$0xff]  ;;  %v306_v12 = vsel %vm304_vm0, %v300_v7, 0.0  ;;  %v310_v13 = vsel %vm304_vm0, %v299_v6, 0.0 }
  0x2f   : > { %v311_v14 = vsel %vm304_vm0, %v301_v8, 0.0  ;;  %v1024_v15 = vld [vmem:[%s1503_s1 + $0x10] sm:$0xff]  ;;  %v307_v16 = vadd.f32 %v306_v12, %v305_v9  ;;  %v308_v17 = vsel %vm304_vm0, %v302_v10, 0.0  ;;  %v313_v19 = vsel %vm304_vm0, %v303_v11, 0.0  ;;  %v337_v20 = vld [vmem:[%s1503_s1] sm:$0xff]  ;;  %v1031_v22 = vld [vmem:[%s1337_s22 + $0x30] sm:$0xff] }
  0x30   : > { %v312_v18 = vadd.f32 %v311_v14, %v310_v13  ;;  %360 = vmatpush.msra.mxu0 %v1024_v15  ;;  %v1037_v21 = vld [vmem:[%s1503_s1 + $0x30] sm:$0xff]  ;;  %384 = vmatpush.msra.mxu1 %v337_v20  ;;  %v1032_v23 = vld [vmem:[%s1337_s22 + $0x38] sm:$0xff]  ;;  %v1033_v24 = vld [vmem:[%s1337_s22 + $0x40] sm:$0xff]  ;;  %v423_v26 = vsel %vm304_vm0, %v1031_v22, 0.0  ;;  %s1161_s23 = sshra.s32 %s954_s20, 4  ;;  %s1167_s9 = scalar_lea.hbm %s1509_s7, 2  ;;  %s1162_s23 = int_to_ptr.hbm [resolvable:$true] %s1161_s23 }
  0x31   : > { %477 = vmatpush.msra.mxu3 %v1037_v21  ;;  %v1034_v25 = vld [vmem:[%s1337_s22 + $0x48] sm:$0xff]  ;;  %v309_v27 = vadd.f32 %v308_v17, %v307_v16  ;;  %v1035_v29 = vld [vmem:[%s1337_s22 + $0x50] sm:$0xff]  ;;  %v1036_v30 = vld [vmem:[%s1337_s22 + $0x58] sm:$0xff]  ;;  %v424_v31 = vsel %vm304_vm0, %v1033_v24, 0.0  ;;  %v428_v32 = vsel %vm304_vm0, %v1032_v23, 0.0  ;;  %s1163_s29 = scalar_lea.hbm %s1162_s23, 1  ;;  %p1168_p3 = scmp.lt.s32.totalorder %s1162_s23, %s1509_s7 }
  0x32   : > { %v314_v28 = vadd.f32 %v313_v19, %v312_v18  ;;  %v1041_v33 = vld [vmem:[%s1503_s1 + $0x48] sm:$0xff]  ;;  %v425_v34 = vadd.f32 %v424_v31, %v423_v26  ;;  %v426_v35 = vsel %vm304_vm0, %v1035_v29, 0.0  ;;  %v429_v36 = vsel %vm304_vm0, %v1034_v25, 0.0  ;;  %v1044_v37 = vld [vmem:[%s1503_s1 + $0x58] sm:$0xff]  ;;  %v1040_v38 = vld [vmem:[%s1503_s1 + $0x40] sm:$0xff]  ;;  %p1164_p6 = scmp.ne.s32.totalorder %s1162_s23, %s1163_s29  ;;  %p1169_p4 = scmp.lt.s32.totalorder %s1167_s9, %s1163_s29 }
  0x33   : > { %503 = vmatpush.msrb.mxu0 %v1041_v33  ;;  %v1043_v39 = vld [vmem:[%s1503_s1 + $0x50] sm:$0xff]  ;;  %v315_v40 = vsel %vm304_vm0, %v309_v27, 0.0  ;;  %v431_v42 = vsel %vm304_vm0, %v1036_v30, 0.0  ;;  %530 = vmatpush.msrb.mxu1 %v1044_v37  ;;  %v430_v45 = vadd.f32 %v429_v36, %v428_v32  ;;  %v334_v59 = vrot.slane %v309_v27, 1  ;;  %v540_v16 = vld [vmem:[%s1505_s3] sm:$0x77] }
  0x34   : > { %v316_v41 = vsel %vm304_vm0, %v314_v28, 0.0  ;;  %v427_v44 = vadd.f32 %v426_v35, %v425_v34  ;;  %v330_v60 = vrot.slane %v314_v28, 7  ;;  %v326_v61 = vrot.slane %v314_v28, 1  ;;  %v541_v17 = vld [vmem:[%s1505_s3 + $0x8] sm:$0x77]  ;;  %p1165_p13 = pnand %p1164_p6, %p1303_p11  ;;  %p1170_p5 = por %p1169_p4, %p1168_p3 }
  0x35   : > { %v317_v43 = vadd.f32 %v316_v41, %v315_v40  ;;  %504 = vmatpush.msrb.mxu0 %v1040_v38  ;;  %531 = vmatpush.msrb.mxu1 %v1043_v39  ;;  %v432_v47 = vadd.f32 %v431_v42, %v430_v45  ;;  %549 = vst [vmem:[#allocation1] ss:$2 sm:$0xff] %v540_v16  ;;  %v542_v22 = vld [vmem:[%s1505_s3 + $0x10] sm:$0x77]  ;;  %v543_v23 = vld [vmem:[%s1505_s3 + $0x18] sm:$0x77] }
  0x36   : > { %v433_v48 = vsel %vm304_vm0, %v427_v44, 0.0  ;;  %v452_v11 = vrot.slane %v427_v44, 1  ;;  %551 = vst [vmem:[#allocation1 + $0x10] ss:$2 sm:$0xff] %v541_v17  ;;  %v538_v39 = vld [vmem:[%s1504_s2] sm:$0x1]  ;;  %p1166_p2 = pneg %p1165_p13 }
  0x37   : > { %v318_v46 = vrot.slane %v317_v43, 4  ;;  %v434_v50 = vsel %vm304_vm0, %v432_v47, 0.0  ;;  %v444_v6 = vrot.slane %v432_v47, 1  ;;  %v448_v8 = vrot.slane %v432_v47, 7  ;;  %553 = vst [vmem:[#allocation1 + $0x20] ss:$2 sm:$0xff] %v542_v22 }
  0x38   : > { %v435_v51 = vadd.f32 %v434_v50, %v433_v48  ;;  %555 = vst [vmem:[#allocation1 + $0x30] ss:$2 sm:$0xff] %v543_v23  ;;  %v764_v42 = vld [vmem:[%s1507_s5 + $0x10] sm:$0x3f]  ;;  %v763_v45 = vld [vmem:[%s1507_s5 + $0x8] sm:$0x3f]  ;;  %p1171_p7 = pnand %p1170_p5, %p1166_p2 }
  0x39   : > { %v319_v49 = vadd.f32 %v318_v46, %v317_v43  ;;  %v765_v43 = vld [vmem:[%s1507_s5 + $0x18] sm:$0x3f]  ;;  %v768_v46 = vld [vmem:[%s1507_s5 + $0x30] sm:$0x3f]  ;;  %v766_v48 = vld [vmem:[%s1507_s5 + $0x20] sm:$0x3f] }
  0x3a   : > { %v436_v53 = vrot.slane %v435_v51, 4  ;;  %v544_v50 = vld [vmem:[%s1506_s4] sm:$0xff] }
  0x3b   : > { %v320_v52 = vrot.slane %v319_v49, 2 }
  0x3c   : > { %v437_v55 = vadd.f32 %v436_v53, %v435_v51  ;;  %v556_v18 = vld.sshfl [vmem:[#allocation1] sm:$0xff pattern:$0x75316420]  ;;  %v557_v19 = vld.sshfl [vmem:[#allocation1 + $0x8] sm:$0xff pattern:$0x75316420] }
  0x3d   : > { %v321_v54 = vadd.f32 %v320_v52, %v319_v49  ;;  %1046 = vmatpush.msk.msrb.mxu2 %vm585_vm1, %v556_v18  ;;  %1048 = vmatpush.msk.msrb.mxu3 %vm585_vm1, %v557_v19  ;;  %v558_v20 = vld.sshfl [vmem:[#allocation1 + $0x10] sm:$0xff pattern:$0x75316420]  ;;  %v559_v21 = vld.sshfl [vmem:[#allocation1 + $0x18] sm:$0xff pattern:$0x75316420] }
  0x3e   : > { %v438_v57 = vrot.slane %v437_v55, 2  ;;  %v560_v24 = vld.sshfl [vmem:[#allocation1 + $0x20] sm:$0xff pattern:$0x75316420]  ;;  %v767_v49 = vld [vmem:[%s1507_s5 + $0x28] sm:$0x3f] }
  0x3f   : > { %v322_v56 = vrot.slane %v321_v54, 1  ;;  %v561_v25 = vld.sshfl [vmem:[#allocation1 + $0x28] sm:$0xff pattern:$0x75316420]  ;;  %v567_v51 = vperm.slane %v544_v50, 2  ;;  %v568_v52 = vperm.slane %v544_v50, 3 }
  0x40   : > { %v439_v62 = vadd.f32 %v438_v57, %v437_v55  ;;  %v562_v26 = vld.sshfl [vmem:[#allocation1 + $0x30] sm:$0xff pattern:$0x75316420]  ;;  %v565_v57 = vperm.slane %v544_v50, 0 }
  0x41   : > { %v323_v58 = vadd.f32 %v322_v56, %v321_v54 }
  0x42   : > { %v440_v1 = vrot.slane %v439_v62, 1 }
  0x43   : > { %v329_v63 = vsub.f32 %v323_v58, %v309_v27  ;;  %v324_v0 = vsub.f32 %v323_v58, %v314_v28  ;;  %v563_v27 = vld.sshfl [vmem:[#allocation1 + $0x38] sm:$0xff pattern:$0x75316420]  ;;  %v566_v58 = vperm.slane %v544_v50, 1 }
  0x44   : > { %v441_v5 = vadd.f32 %v440_v1, %v439_v62  ;;  %v572_v62 = vperm.slane %v544_v50, 7 }
  0x45   : > { %v336_v2 = vsub.f32 %v329_v63, %v334_v59  ;;  %v332_v3 = vsub.f32 %v329_v63, %v330_v60  ;;  %v328_v4 = vsub.f32 %v324_v0, %v326_v61  ;;  %v571_v61 = vperm.slane %v544_v50, 6 }
  0x46   : > { %v442_v9 = vsub.f32 %v441_v5, %v432_v47  ;;  %v447_v10 = vsub.f32 %v441_v5, %v427_v44  ;;  %v762_v44 = vld [vmem:[%s1507_s5] sm:$0x3f]  ;;  %v769_v47 = vld [vmem:[%s1507_s5 + $0x38] sm:$0x3f]  ;;  %v569_v5 = vperm.slane %v544_v50, 4 }
  0x47   : > { %1030 = vmatmul.msk.f32.vlgmr.msra.gmra.mxu2 %vm304_vm0, %v336_v2  ;;  %1026 = vmatmul.msk.f32.vlgmr.msra.gmra.mxu0 %vm304_vm0, %v332_v3  ;;  %v366_v7 = vrot.slane %v328_v4, 6 }
  0x48   : > { %v446_v12 = vsub.f32 %v442_v9, %v444_v6  ;;  %v450_v13 = vsub.f32 %v447_v10, %v448_v8  ;;  %v454_v15 = vsub.f32 %v447_v10, %v452_v11  ;;  %1050 = vmatpush.msk.msra.mxu0 %vm585_vm1, %v558_v20  ;;  %1054 = vmatpush.msk.msra.mxu2 %vm585_vm1, %v560_v24  ;;  %v570_v6 = vperm.slane %v544_v50, 5  ;;  %v770_v11 = vld [vmem:[%s1508_s6] sm:$0x1] }
  0x49   : > { %1027 = vmatmul.msk.f32.vlgmr.msra.gmra.mxu1 %vm304_vm0, %v366_v7 }
  0x4a   : > { %v459_v14 = vrot.slane %v446_v12, 6  ;;  %1052 = vmatpush.msk.msra.mxu1 %vm585_vm1, %v559_v21 }
  0x4c   : > { %1039 = vmatmul.msk.f32.vlgmr.msra.gmra.mxu3 %vm304_vm0, %v459_v14 }
  0x4d   : > { %1056 = vmatpush.msk.msra.mxu3 %vm585_vm1, %v561_v25 }
  0x4f   : > { %1042 = vmatmul.msk.f32.vlgmr.msrb.gmra.mxu0 %vm304_vm0, %v450_v13 }
  0x50   : > { %1058 = vmatpush.msk.msrb.mxu0 %vm585_vm1, %v562_v26 }
  0x51   : > { %1045 = vmatmul.msk.f32.vlgmr.msrb.gmra.mxu1 %vm304_vm0, %v454_v15 }
  0x52   : > { %1060 = vmatpush.msk.msrb.mxu1 %vm585_vm1, %v563_v27 }
  0xc4   : > { %v362_v28 = vpop.f32.mrf.mxu0 }
  0xc6   : > { %v386_v29 = vpop.f32.mrf.mxu1 }
  0xc7   : > { %v387_v31 = vadd.f32 %v386_v29, %v362_v28 }
  0xca   : > { %v412_v30 = vpop.f32.mrf.mxu2 }
  0xcb   : > { %v415_v32 = vadd.f32 %v412_v30, %v387_v31 }
  0xcc   : > { %v506_v34 = vpop.f32.mrf.mxu0 }
  0xce   : > { %v533_v36 = vpop.f32.mrf.mxu1 }
  0xcf   : > { %v479_v33 = vpop.f32.mrf.mxu3 }
  0xd0   : > { %v482_v35 = vadd.f32 %v479_v33, %v415_v32 }
  0xd2   : > { %v509_v37 = vadd.f32 %v506_v34, %v482_v35 }
  0xd4   : > { %v536_v38 = vadd.f32 %v533_v36, %v509_v37 }
  0xd6   : > { %v537_v40 = vmul.f32 0.0017006802, %v536_v38 }
  0xd8   : > { %v539_v41 = vadd.f32 %v538_v39, %v537_v40 }
  0xda   : > { %1047 = vmatmul.msk.f32.vlgmr.msrb.gmra.mxu2 %vm581_vm2, %v539_v41  ;;  %1049 = vmatmul.msk.f32.vlgmr.msrb.gmra.mxu3 %vm581_vm2, %v539_v41 }
  0xdb   : > { %1051 = vmatmul.msk.f32.vlgmr.msra.gmra.mxu0 %vm581_vm2, %v539_v41  ;;  %1053 = vmatmul.msk.f32.vlgmr.msra.gmra.mxu1 %vm581_vm2, %v539_v41 }
  0xdc   : > { %833 = vmatpush.xpose.msra.mxu0 %v764_v42  ;;  %853 = vmatpush.xpose.msra.mxu1 %v765_v43 }
  0xdd   : > { %793 = vmatpush.xpose.msrb.mxu2 %v762_v44  ;;  %813 = vmatpush.xpose.msrb.mxu3 %v763_v45 }
  0xe2   : > { %1055 = vmatmul.msk.f32.vlgmr.msra.gmra.mxu2 %vm581_vm2, %v539_v41  ;;  %1057 = vmatmul.msk.f32.vlgmr.msra.gmra.mxu3 %vm581_vm2, %v539_v41 }
  0xe3   : > { %1059 = vmatmul.msk.f32.vlgmr.msrb.gmra.mxu0 %vm581_vm2, %v539_v41  ;;  %1061 = vmatmul.msk.f32.vlgmr.msrb.gmra.mxu1 %vm581_vm2, %v539_v41 }
  0xe4   : > { %913 = vmatpush.xpose.msrb.mxu0 %v768_v46  ;;  %1062 = vmatpush.xpose.msk.msrb.mxu1 %vm771_vm3, %v769_v47 }
  0xe5   : > { %873 = vmatpush.xpose.msra.mxu2 %v766_v48  ;;  %893 = vmatpush.xpose.msra.mxu3 %v767_v49 }
 0x158   : > { %v659_v53 = vpop.f32.mrf.mxu0  ;;  %v679_v54 = vpop.f32.mrf.mxu1 }
 0x159   : > { %v660_v55 = vadd.f32 %v659_v53, %v567_v51  ;;  %v680_v56 = vadd.f32 %v679_v54, %v568_v52 }
 0x15b   : > { %834 = vmatmul.f32.vlgmr.msra.gmra.mxu0 %v660_v55  ;;  %854 = vmatmul.f32.vlgmr.msra.gmra.mxu1 %v680_v56 }
 0x15d   : > { %v619_v59 = vpop.f32.mrf.mxu2  ;;  %v639_v60 = vpop.f32.mrf.mxu3 }
 0x15e   : > { %v620_v63 = vadd.f32 %v619_v59, %v565_v57  ;;  %v640_v0 = vadd.f32 %v639_v60, %v566_v58 }
 0x160   : > { %v739_v1 = vpop.f32.mrf.mxu0  ;;  %v759_v2 = vpop.f32.mrf.mxu1  ;;  %794 = vmatmul.f32.vlgmr.msrb.gmra.mxu2 %v620_v63  ;;  %814 = vmatmul.f32.vlgmr.msrb.gmra.mxu3 %v640_v0 }
 0x161   : > { %v740_v3 = vadd.f32 %v739_v1, %v571_v61  ;;  %v760_v4 = vadd.f32 %v759_v2, %v572_v62 }
 0x163   : > { %914 = vmatmul.f32.vlgmr.msrb.gmra.mxu0 %v740_v3  ;;  %1063 = vmatmul.msk.f32.vlgmr.msrb.gmra.mxu1 %vm771_vm3, %v760_v4 }
 0x165   : > { %v699_v7 = vpop.f32.mrf.mxu2  ;;  %v719_v8 = vpop.f32.mrf.mxu3 }
 0x166   : > { %v700_v9 = vadd.f32 %v699_v7, %v569_v5  ;;  %v720_v10 = vadd.f32 %v719_v8, %v570_v6 }
 0x168   : > { %874 = vmatmul.f32.vlgmr.msra.gmra.mxu2 %v700_v9  ;;  %894 = vmatmul.f32.vlgmr.msra.gmra.mxu3 %v720_v10 }
 0x1d8   : > { %v835_v15 = vpop.f32.mrf.mxu0  ;;  %v855_v17 = vpop.f32.mrf.mxu1 }
 0x1e0   : > { %v915_v24 = vpop.f32.mrf.mxu0  ;;  %v935_v26 = vpop.f32.mrf.mxu1 }
 0x1e3   : > { %v795_v12 = vpop.f32.mrf.mxu2  ;;  %v815_v13 = vpop.f32.mrf.mxu3 }
 0x1e4   : > { %v796_v14 = vadd.f32 %v795_v12, %v770_v11 }
 0x1e6   : > { %v816_v16 = vadd.f32 %v815_v13, %v796_v14 }
 0x1e8   : > { %v836_v18 = vadd.f32 %v835_v15, %v816_v16 }
 0x1ea   : > { %v856_v19 = vadd.f32 %v855_v17, %v836_v18 }
 0x1eb   : > { %v875_v20 = vpop.f32.mrf.mxu2  ;;  %v895_v22 = vpop.f32.mrf.mxu3 }
 0x1ec   : > { %v876_v21 = vadd.f32 %v875_v20, %v856_v19 }
 0x1ee   : > { %v896_v23 = vadd.f32 %v895_v22, %v876_v21 }
 0x1f0   : > { %v916_v25 = vadd.f32 %v915_v24, %v896_v23 }
 0x1f2   : > { %v936_v27 = vadd.f32 %v935_v26, %v916_v25 }
 0x1f4   : > { %939 = vst.msk [vmem:[%s297_s26] sm:$0x1] %vm938_vm4, %v936_v27 }
 0x1f5   : > { %1174 = shalt.err (!%p1171_p7)
}
 0x1f6   : > { %1071 = dma.vmem_to_hbm [thread:$0]  (%p1303_p11), %s952_s10, 16, %s954_s20, %s941_s21  }
 0x1f7 PF: > { %s965_s19 = sand.u32 1, %s1201_s24   ;;  %p1078_p8 = pnand %p1021_p9, %p1307_p12 }
 0x1f8   : > { %s966_s15 = scalar_lea.sflag [#allocation4], %s965_s19 }
 0x1f9   : > { %p1079_p10 = pneg %p1078_p8 }
 0x1fb   : > { %1196 = dma.done.wait (%p1079_p10), %s966_s15, 16  }
 0x1fc   : > { %1198 = vsyncadd (%p1079_p10), %s966_s15, 4294967280  ;;  %s1517_s17 = sld [smem:[#allocation8_spill]]  ;;  %p20_p0 = scmp.ge.s32.totalorder %s1282_s30, 4  }
 0x1fd   : > { %s1518_s26 = sld [smem:[#allocation9_spill]]  ;;  %s1519_s24 = smov %s1205_s25 }
 0x1fe   : > { %s1521_s27 = smov %s1282_s30  ;;  %22 = sbr.rel (!%p20_p0) target bundleno = 5 (0x5), region = 102 }
 0x202   : > { %s1520_s25 = smov %s1517_s17 }
 0x203   :  { %971 = vsyncpa [#allocation3], 1 }
 0x204   :  { %973 = vsyncpa [#allocation3 + $0x1], 1 }
 0x205   :  { %974 = vsyncpa [#allocation4], 1 }
 0x206   :  { %976 = vsyncpa [#allocation4 + $0x1], 1 }

</bundles_post_ra>
